<compile_context>
chip_gen: v6e
topology: v6e:2x2x1
jax: 0.10.0
libtpu: 0.0.40
codegen_flags: <defaults>
</compile_context>

<pallas_src>
from functools import partial

import jax
import jax.numpy as jnp
from jax import lax
from jax.experimental import pallas as pl
from jax.experimental.pallas import tpu as pltpu


def basic_block_kernel(x_ref, a1_ref, b1_ref, a2_ref, b2_ref, o_ref, *,
                       img_h, mxu_dtype):
    """One grid step: TB images stacked along rows, LP images along lanes.

    x_ref  : (1, TB*H, LP*W*C)    f32 activations (also the residual)
    a*_ref : (3*LP*W*C, LP*W*C)   dy-folded, LP-block-diagonal band matrices
                                  (BN scale folded in), mxu_dtype
    b*_ref : (1, LP*W*C)          per-lane bias row, f32
    o_ref  : (1, TB*H, LP*W*C)    f32
    """
    x = x_ref[0]                                   # (M, L) f32
    m = x.shape[0]

    # Per-image row masks for the vertical halo: the rolls below must neither
    # wrap around the block nor leak rows across images stacked on sublanes.
    row = lax.broadcasted_iota(jnp.int32, (m, 1), 0) % img_h
    not_first = row != 0
    not_last = row != (img_h - 1)

    def halo_cat(inp):
        # dy=0 tap reads input row r-1 ("shift down"); dy=2 tap reads r+1.
        down = jnp.where(not_first, pltpu.roll(inp, shift=1, axis=0), 0.0)
        up = jnp.where(not_last, pltpu.roll(inp, shift=m - 1, axis=0), 0.0)
        # K order [down | center | up] matches the band-matrix stacking.
        return jnp.concatenate([down, inp, up], axis=-1).astype(mxu_dtype)

    def conv_bn(inp, a_ref, b_ref):
        # Single deep-K MXU pass: M = TB*H, K = 3*LP*W*C, N = LP*W*C.
        acc = jnp.dot(halo_cat(inp), a_ref[...],
                      preferred_element_type=jnp.float32)
        return acc + b_ref[...]

    h1 = jnp.maximum(conv_bn(x, a1_ref, b1_ref), 0.0)     # conv1 + bn1 + relu
    h2 = conv_bn(h1, a2_ref, b2_ref)                      # conv2 + bn2
    o_ref[0] = jnp.maximum(h2 + x, 0.0).astype(o_ref.dtype)  # + residual, relu


def _build_band(w_hwio, w_cols):
    """Per-dy band matrices [(W*Cin, W*Cout)] * 3.

    dx taps and horizontal zero padding are baked into the band:
      A[dy][w'*Cin + ci, w*Cout + co] = w[dy, w'-w+1, ci, co] if |w'-w| <= 1.
    """
    _, _, cin, cout = w_hwio.shape
    src = jnp.arange(w_cols)[:, None]          # source column w'
    dst = jnp.arange(w_cols)[None, :]          # destination column w
    dx = src - dst + 1                         # tap index, valid in {0,1,2}
    valid = (dx >= 0) & (dx <= 2)
    dxc = jnp.clip(dx, 0, 2)
    mats = []
    for dy in range(3):
        blk = w_hwio[dy][dxc]                                  # (W, W, Cin, Cout)
        blk = jnp.where(valid[:, :, None, None], blk, 0.0)
        mats.append(jnp.transpose(blk, (0, 2, 1, 3))
                    .reshape(w_cols * cin, w_cols * cout))
    return mats


def _build_banded_packed(w_hwio, w_cols, lane_pack):
    """Stacked, K-folded band matrix (3*LP*W*Cin, LP*W*Cout).

    Block-diagonal over the LP lane-packed images; the three dy bands are
    concatenated along the contraction axis in [down, center, up] order so a
    conv becomes a single deep-K matmul inside the kernel.
    """
    _, _, cin, cout = w_hwio.shape
    lin, lout = w_cols * cin, w_cols * cout
    packed = []
    for band in _build_band(w_hwio, w_cols):
        big = jnp.zeros((lane_pack * lin, lane_pack * lout), jnp.float32)
        for p in range(lane_pack):
            big = big.at[p * lin:(p + 1) * lin,
                         p * lout:(p + 1) * lout].set(band)
        packed.append(big)
    return jnp.concatenate(packed, axis=0)


def basic_block_pallas(x_nchw, w1_hwio, s1, b1, w2_hwio, s2, b2, *,
                       mxu_dtype=jnp.bfloat16,
                       lane_target=128, row_target=128):
    """x_nchw: (B, C, H, W) float32.  Conv weights in HWIO: (3, 3, Cin, Cout)."""
    B, C, H, W = x_nchw.shape
    Cp = w1_hwio.shape[-1]
    assert Cp == C, "identity residual requires inplanes == planes"

    # --- batch packing factors --------------------------------------------
    wc = W * C
    LP = min(max(1, -(-lane_target // wc)), B)   # images packed along lanes
    groups = -(-B // LP)                         # batch groups left
    TB = min(max(1, row_target // H), groups)    # images stacked along rows
    per_step = LP * TB
    # Note: on v7x prefer a grid of length >= 2 (two TensorCores); here the
    # tiny demo batch collapses to a single step, which is fine.
    G = -(-B // per_step)
    Bp = G * per_step

    # NCHW -> NHWC.  TODO(synk): keep the surrounding network NHWC /
    # lane-packed end-to-end so these two transposes leave the hot path.
    x_nhwc = jnp.transpose(x_nchw, (0, 2, 3, 1)).astype(jnp.float32)
    if Bp != B:
        x_nhwc = jnp.concatenate(
            [x_nhwc, jnp.zeros((Bp - B, H, W, C), jnp.float32)], axis=0)

    # (Bp,H,W,C) -> (G, TB*H, LP*W*C): TB images on sublanes, LP on lanes.
    x_pack = (x_nhwc.reshape(G, TB, LP, H, W, C)
              .transpose(0, 1, 3, 2, 4, 5)
              .reshape(G, TB * H, LP * W * C))

    # --- weight prep (one-off; BN scale folded in f32, then MXU dtype) -----
    w1s = w1_hwio.astype(jnp.float32) * s1.astype(jnp.float32)[None, None, None, :]
    w2s = w2_hwio.astype(jnp.float32) * s2.astype(jnp.float32)[None, None, None, :]
    a1 = _build_banded_packed(w1s, W, LP).astype(mxu_dtype)   # (3*L, L)
    a2 = _build_banded_packed(w2s, W, LP).astype(mxu_dtype)
    b1row = jnp.tile(b1.astype(jnp.float32), LP * W).reshape(1, LP * W * Cp)
    b2row = jnp.tile(b2.astype(jnp.float32), LP * W).reshape(1, LP * W * Cp)

    L = LP * W * C
    M = TB * H
    kernel = partial(basic_block_kernel, img_h=H, mxu_dtype=mxu_dtype)

    out_pack = pl.pallas_call(
        kernel,
        out_shape=jax.ShapeDtypeStruct((G, M, L), jnp.float32),
        grid=(G,),
        in_specs=[
            pl.BlockSpec((1, M, L), lambda g: (g, 0, 0)),
            pl.BlockSpec((3 * L, L), lambda g: (0, 0)),
            pl.BlockSpec((1, L), lambda g: (0, 0)),
            pl.BlockSpec((3 * L, L), lambda g: (0, 0)),
            pl.BlockSpec((1, L), lambda g: (0, 0)),
        ],
        out_specs=pl.BlockSpec((1, M, L), lambda g: (g, 0, 0)),
        compiler_params=pltpu.CompilerParams(
            dimension_semantics=("parallel",)),
    )(x_pack, a1, b1row, a2, b2row)

    out_nhwc = (out_pack.reshape(G, TB, H, LP, W, Cp)
                .transpose(0, 1, 3, 2, 4, 5)
                .reshape(Bp, H, W, Cp))[:B]
    return jnp.transpose(out_nhwc, (0, 3, 1, 2))      # back to NCHW


def reference_jax(x_nchw, w1_hwio, s1, b1, w2_hwio, s2, b2):
    """Pure-JAX reference (lax convs, unfolded BN) for correctness check."""
    x = jnp.transpose(x_nchw, (0, 2, 3, 1))
    dn = lax.conv_dimension_numbers(x.shape, w1_hwio.shape, ("NHWC", "HWIO", "NHWC"))
    o = lax.conv_general_dilated(x, w1_hwio, (1, 1), "SAME", dimension_numbers=dn)
    o = jnp.maximum(o * s1 + b1, 0.0)
    o = lax.conv_general_dilated(o, w2_hwio, (1, 1), "SAME", dimension_numbers=dn)
    o = o * s2 + b2
    o = jnp.maximum(o + x, 0.0)
    return jnp.transpose(o, (0, 3, 1, 2))


def fold_bn(gamma, beta, mean, var, eps=1e-5):
    scale = gamma / jnp.sqrt(var + eps)
    bias = beta - mean * scale
    return scale, bias


if __name__ == "__main__":
    B, C, H, W = 2, 4, 16, 16          # inplanes == planes == 4, stride=1
    key = jax.random.PRNGKey(0)
    ks = jax.random.split(key, 11)

    x = jax.random.normal(ks[0], (B, C, H, W), jnp.float32)

    # conv weights (HWIO), deterministic init
    w1 = jax.random.normal(ks[1], (3, 3, C, C), jnp.float32) * 0.1
    w2 = jax.random.normal(ks[2], (3, 3, C, C), jnp.float32) * 0.1

    # BatchNorm params (inference-mode / running stats, folded)
    g1 = 1.0 + 0.1 * jax.random.normal(ks[3], (C,), jnp.float32)
    be1 = 0.1 * jax.random.normal(ks[4], (C,), jnp.float32)
    m1 = 0.1 * jax.random.normal(ks[5], (C,), jnp.float32)
    v1 = 1.0 + 0.1 * jax.random.uniform(ks[6], (C,), jnp.float32)
    g2 = 1.0 + 0.1 * jax.random.normal(ks[7], (C,), jnp.float32)
    be2 = 0.1 * jax.random.normal(ks[8], (C,), jnp.float32)
    m2 = 0.1 * jax.random.normal(ks[9], (C,), jnp.float32)
    v2 = 1.0 + 0.1 * jax.random.uniform(ks[10], (C,), jnp.float32)

    s1, b1 = fold_bn(g1, be1, m1, v1)
    s2, b2 = fold_bn(g2, be2, m2, v2)

    ref = reference_jax(x, w1, s1, b1, w2, s2, b2)

    # f32 MXU path: tight check against the pure-JAX reference.
    out_f32 = jax.block_until_ready(
        basic_block_pallas(x, w1, s1, b1, w2, s2, b2, mxu_dtype=jnp.float32))
    assert out_f32.shape == (B, C, H, W)
    assert jnp.allclose(out_f32, ref, rtol=1e-3, atol=1e-3), "f32 mismatch"

    # bf16 MXU path (production config on v5e/v6e/v7x): f32 accumulation,
    # BN scale folded in f32 before the downcast, residual stays f32.
    out_bf16 = jax.block_until_ready(
        basic_block_pallas(x, w1, s1, b1, w2, s2, b2, mxu_dtype=jnp.bfloat16))
    assert out_bf16.shape == (B, C, H, W)
    assert jnp.allclose(out_bf16, ref, rtol=5e-2, atol=5e-2), "bf16 mismatch"

    print("KERNEL_OK")
</pallas_src>

<mosaic_0001>
module attributes {stable_mosaic.version = 11 : i64} {
  func.func @basic_block_kernel(%arg0: i32, %arg1: memref<1x16x128xf32, #tpu.memory_space<vmem>>, %arg2: memref<384x128xf32, #tpu.memory_space<vmem>>, %arg3: memref<1x128xf32, #tpu.memory_space<vmem>>, %arg4: memref<384x128xf32, #tpu.memory_space<vmem>>, %arg5: memref<1x128xf32, #tpu.memory_space<vmem>>, %arg6: memref<1x16x128xf32, #tpu.memory_space<vmem>>) attributes {dimension_semantics = [#tpu.dimension_semantics<parallel>], iteration_bounds = array<i64: 1>, scalar_prefetch = 0 : i64, scratch_operands = 0 : i64, tpu.core_type = #tpu.core_type<tc>, window_params = [{transform_indices = @transform_0, window_bounds = array<i64: 1, 16, 128>}, {pipeline_mode = #tpu.pipeline_mode<synchronous>, transform_indices = @transform_1, window_bounds = array<i64: 384, 128>}, {pipeline_mode = #tpu.pipeline_mode<synchronous>, transform_indices = @transform_2, window_bounds = array<i64: 1, 128>}, {pipeline_mode = #tpu.pipeline_mode<synchronous>, transform_indices = @transform_3, window_bounds = array<i64: 384, 128>}, {pipeline_mode = #tpu.pipeline_mode<synchronous>, transform_indices = @transform_4, window_bounds = array<i64: 1, 128>}, {transform_indices = @transform_5, window_bounds = array<i64: 1, 16, 128>}]} {
    %c0 = arith.constant 0 : index
    %c0_0 = arith.constant 0 : index
    %c0_1 = arith.constant 0 : index
    %0 = vector.load %arg1[%c0, %c0_0, %c0_1] : memref<1x16x128xf32, #tpu.memory_space<vmem>>, vector<1x16x128xf32>
    %1 = vector.shape_cast %0 : vector<1x16x128xf32> to vector<16x128xf32>
    %2 = tpu.iota {dimensions = array<i32: 0>} : vector<16x1xi32>
    %c16_i32 = arith.constant 16 : i32
    %c0_i32 = arith.constant 0 : i32
    %3 = arith.cmpi eq, %c16_i32, %c0_i32 : i32
    %c1_i32 = arith.constant 1 : i32
    %4 = arith.select %3, %c1_i32, %c16_i32 : i32
    %5 = vector.broadcast %4 : i32 to vector<16x1xi32>
    %6 = arith.remsi %2, %5 : vector<16x1xi32>
    %c0_i32_2 = arith.constant 0 : i32
    %7 = vector.broadcast %c0_i32_2 : i32 to vector<16x1xi32>
    %8 = arith.cmpi ne, %6, %7 : vector<16x1xi32>
    %c0_i32_3 = arith.constant 0 : i32
    %9 = vector.broadcast %c0_i32_3 : i32 to vector<16x1xi32>
    %10 = arith.cmpi slt, %6, %9 : vector<16x1xi32>
    %c0_i32_4 = arith.constant 0 : i32
    %11 = arith.cmpi slt, %4, %c0_i32_4 : i32
    %12 = vector.broadcast %11 : i1 to vector<16x1xi1>
    %13 = vector.broadcast %12 : vector<16x1xi1> to vector<16x1xi1>
    %14 = arith.xori %10, %13 : vector<16x1xi1>
    %15 = arith.andi %14, %8 : vector<16x1xi1>
    %16 = vector.broadcast %4 : i32 to vector<16x1xi32>
    %17 = arith.addi %6, %16 : vector<16x1xi32>
    %18 = arith.select %15, %17, %6 : vector<16x1xi1>, vector<16x1xi32>
    %c0_i32_5 = arith.constant 0 : i32
    %19 = vector.broadcast %c0_i32_5 : i32 to vector<16x1xi32>
    %20 = arith.cmpi ne, %18, %19 : vector<16x1xi32>
    %c15_i32 = arith.constant 15 : i32
    %21 = vector.broadcast %c15_i32 : i32 to vector<16x1xi32>
    %22 = arith.cmpi ne, %18, %21 : vector<16x1xi32>
    %c1_i32_6 = arith.constant 1 : i32
    %23 = tpu.dynamic_rotate %1 by %c1_i32_6 dim 0 : vector<16x128xf32>, i32 -> vector<16x128xf32>
    %cst = arith.constant 0.000000e+00 : f32
    %24 = vector.shape_cast %20 : vector<16x1xi1> to vector<16x1xi1>
    %25 = vector.broadcast %24 : vector<16x1xi1> to vector<16x128xi1>
    %26 = vector.broadcast %cst : f32 to vector<16x128xf32>
    %27 = arith.select %25, %23, %26 : vector<16x128xi1>, vector<16x128xf32>
    %c15_i32_7 = arith.constant 15 : i32
    %28 = tpu.dynamic_rotate %1 by %c15_i32_7 dim 0 : vector<16x128xf32>, i32 -> vector<16x128xf32>
    %cst_8 = arith.constant 0.000000e+00 : f32
    %29 = vector.shape_cast %22 : vector<16x1xi1> to vector<16x1xi1>
    %30 = vector.broadcast %29 : vector<16x1xi1> to vector<16x128xi1>
    %31 = vector.broadcast %cst_8 : f32 to vector<16x128xf32>
    %32 = arith.select %30, %28, %31 : vector<16x128xi1>, vector<16x128xf32>
    %33 = tpu.concatenate %27, %1, %32 in 1 : vector<16x128xf32>, vector<16x128xf32>, vector<16x128xf32> -> vector<16x384xf32>
    %c0_9 = arith.constant 0 : index
    %c0_10 = arith.constant 0 : index
    %34 = vector.load %arg2[%c0_9, %c0_10] : memref<384x128xf32, #tpu.memory_space<vmem>>, vector<384x128xf32>
    %cst_11 = arith.constant dense<0.000000e+00> : vector<16x128xf32>
    %35 = tpu.matmul %33, %34, %cst_11 {dimension_numbers = #tpu.dot_dimension_numbers<[1], [0], [0], [1], [0, 0, 1, 1], [], []>} : vector<16x384xf32>, vector<384x128xf32>, vector<16x128xf32> -> vector<16x128xf32>
    %c0_12 = arith.constant 0 : index
    %c0_13 = arith.constant 0 : index
    %36 = vector.load %arg3[%c0_12, %c0_13] : memref<1x128xf32, #tpu.memory_space<vmem>>, vector<1x128xf32>
    %37 = vector.broadcast %36 : vector<1x128xf32> to vector<16x128xf32>
    %38 = arith.addf %35, %37 : vector<16x128xf32>
    %cst_14 = arith.constant 0.000000e+00 : f32
    %39 = vector.broadcast %cst_14 : f32 to vector<16x128xf32>
    %40 = arith.maximumf %38, %39 : vector<16x128xf32>
    %c1_i32_15 = arith.constant 1 : i32
    %41 = tpu.dynamic_rotate %40 by %c1_i32_15 dim 0 : vector<16x128xf32>, i32 -> vector<16x128xf32>
    %cst_16 = arith.constant 0.000000e+00 : f32
    %42 = vector.shape_cast %20 : vector<16x1xi1> to vector<16x1xi1>
    %43 = vector.broadcast %42 : vector<16x1xi1> to vector<16x128xi1>
    %44 = vector.broadcast %cst_16 : f32 to vector<16x128xf32>
    %45 = arith.select %43, %41, %44 : vector<16x128xi1>, vector<16x128xf32>
    %c15_i32_17 = arith.constant 15 : i32
    %46 = tpu.dynamic_rotate %40 by %c15_i32_17 dim 0 : vector<16x128xf32>, i32 -> vector<16x128xf32>
    %cst_18 = arith.constant 0.000000e+00 : f32
    %47 = vector.shape_cast %22 : vector<16x1xi1> to vector<16x1xi1>
    %48 = vector.broadcast %47 : vector<16x1xi1> to vector<16x128xi1>
    %49 = vector.broadcast %cst_18 : f32 to vector<16x128xf32>
    %50 = arith.select %48, %46, %49 : vector<16x128xi1>, vector<16x128xf32>
    %51 = tpu.concatenate %45, %40, %50 in 1 : vector<16x128xf32>, vector<16x128xf32>, vector<16x128xf32> -> vector<16x384xf32>
    %c0_19 = arith.constant 0 : index
    %c0_20 = arith.constant 0 : index
    %52 = vector.load %arg4[%c0_19, %c0_20] : memref<384x128xf32, #tpu.memory_space<vmem>>, vector<384x128xf32>
    %cst_21 = arith.constant dense<0.000000e+00> : vector<16x128xf32>
    %53 = tpu.matmul %51, %52, %cst_21 {dimension_numbers = #tpu.dot_dimension_numbers<[1], [0], [0], [1], [0, 0, 1, 1], [], []>} : vector<16x384xf32>, vector<384x128xf32>, vector<16x128xf32> -> vector<16x128xf32>
    %c0_22 = arith.constant 0 : index
    %c0_23 = arith.constant 0 : index
    %54 = vector.load %arg5[%c0_22, %c0_23] : memref<1x128xf32, #tpu.memory_space<vmem>>, vector<1x128xf32>
    %55 = vector.broadcast %54 : vector<1x128xf32> to vector<16x128xf32>
    %56 = arith.addf %53, %55 : vector<16x128xf32>
    %57 = arith.addf %56, %1 : vector<16x128xf32>
    %cst_24 = arith.constant 0.000000e+00 : f32
    %58 = vector.broadcast %cst_24 : f32 to vector<16x128xf32>
    %59 = arith.maximumf %57, %58 : vector<16x128xf32>
    %c0_25 = arith.constant 0 : index
    %c0_26 = arith.constant 0 : index
    %c0_27 = arith.constant 0 : index
    %60 = vector.load %arg6[%c0_25, %c0_26, %c0_27] : memref<1x16x128xf32, #tpu.memory_space<vmem>>, vector<1x16x128xf32>
    %61 = vector.shape_cast %60 : vector<1x16x128xf32> to vector<16x128xf32>
    %62 = vector.shape_cast %59 : vector<16x128xf32> to vector<1x16x128xf32>
    tpu.vector_store %arg6[%c0_25, %c0_26, %c0_27], %62 {strides = array<i32>} : memref<1x16x128xf32, #tpu.memory_space<vmem>>, vector<1x16x128xf32>,
    return
  }
  func.func @transform_0(%arg0: i32) -> (i32, i32, i32) {
    %c0_i32 = arith.constant 0 : i32
    %c0_i32_0 = arith.constant 0 : i32
    %c0_i32_1 = arith.constant 0 : i32
    return %arg0, %c0_i32, %c0_i32_0 : i32, i32, i32
  }
  func.func @transform_1(%arg0: i32) -> (i32, i32) {
    %c0_i32 = arith.constant 0 : i32
    %c0_i32_0 = arith.constant 0 : i32
    %c0_i32_1 = arith.constant 0 : i32
    return %c0_i32, %c0_i32_0 : i32, i32
  }
  func.func @transform_2(%arg0: i32) -> (i32, i32) {
    %c0_i32 = arith.constant 0 : i32
    %c0_i32_0 = arith.constant 0 : i32
    %c0_i32_1 = arith.constant 0 : i32
    return %c0_i32, %c0_i32_0 : i32, i32
  }
  func.func @transform_3(%arg0: i32) -> (i32, i32) {
    %c0_i32 = arith.constant 0 : i32
    %c0_i32_0 = arith.constant 0 : i32
    %c0_i32_1 = arith.constant 0 : i32
    return %c0_i32, %c0_i32_0 : i32, i32
  }
  func.func @transform_4(%arg0: i32) -> (i32, i32) {
    %c0_i32 = arith.constant 0 : i32
    %c0_i32_0 = arith.constant 0 : i32
    %c0_i32_1 = arith.constant 0 : i32
    return %c0_i32, %c0_i32_0 : i32, i32
  }
  func.func @transform_5(%arg0: i32) -> (i32, i32, i32) {
    %c0_i32 = arith.constant 0 : i32
    %c0_i32_0 = arith.constant 0 : i32
    %c0_i32_1 = arith.constant 0 : i32
    return %arg0, %c0_i32, %c0_i32_0 : i32, i32, i32
  }
}

</mosaic_0001>

<bundles_post_ra>
// kernel: tpu_custom_call.1
= control target key start
LH: loop header
LB: loop body
LE: loop exit
PB: predicated region body
PF: predicated region fallthrough
CT: control target
= control target key end

     0   :  { %10 = vsyncpa [#allocation3], 0  ;;  %s961_s0 = inlined_call_operand.hbm [shape: f32[1,16,128], index: 0, kind: input, shape index: {}]   ;;  %s962_s1 = inlined_call_operand.hbm [shape: f32[384,128], index: 1, kind: input, shape index: {}]   ;;  %s963_s2 = inlined_call_operand.vmem [shape: f32[1,128], index: 2, kind: input, shape index: {}]   ;;  %s964_s3 = inlined_call_operand.hbm [shape: f32[384,128], index: 3, kind: input, shape index: {}]   ;;  %s965_s4 = inlined_call_operand.vmem [shape: f32[1,128], index: 4, kind: input, shape index: {}]   ;;  %s966_s5 = inlined_call_operand.hbm [shape: f32[1,16,128], index: 5, kind: output, shape index: {}]  }
   0x1   :  { %11 = vsyncpa [#allocation6], 0 }
   0x2   :  { %12 = vsyncpa [#allocation4], 0  ;;  %s845_s18 = smov [#allocation5]   ;;  %s846_s20 = smov [#allocation2]  }
   0x3   :  { %s30_s19 = sshll.u32 %s845_s18, 4  ;;  %s18_s21 = sshll.u32 %s846_s20, 4  ;;  %s31_s19 = int_to_ptr.vmem [resolvable:$true] %s30_s19  ;;  %s19_s21 = int_to_ptr.vmem [resolvable:$true] %s18_s21 }
   0x4   :  { %s767_s22 = scalar_lea.vmem %s31_s19, 6144  ;;  %p772_p1 = scmp.lt.s32.totalorder %s31_s19, %s31_s19 }
   0x5   :  { %p768_p0 = scmp.ne.s32.totalorder %s31_s19, %s767_s22  ;;  %p773_p2 = scmp.lt.s32.totalorder %s767_s22, %s767_s22 }
   0x7   :  { %p774_p3 = por %p773_p2, %p772_p1 }
   0x9   :  { %p775_p4 = pnand %p774_p3, %p768_p0 }
   0xb   :  { %778 = shalt.err (!%p775_p4)
}
   0xc   :  { %s847_s23 = smov 128   ;;  %s848_s24 = smov 8  }
   0xd   :  { %36 = dma.hbm_to_vmem [thread:$0]  %s962_s1, 6144, %s31_s19, [#allocation6], %s847_s23, %s847_s23, %s848_s24  }
   0xe   :  { %s787_s27 = scalar_lea.vmem %s19_s21, 256  ;;  %p792_p6 = scmp.lt.s32.totalorder %s19_s21, %s19_s21 }
   0xf   :  { %p788_p5 = scmp.ne.s32.totalorder %s19_s21, %s787_s27  ;;  %p793_p7 = scmp.lt.s32.totalorder %s787_s27, %s787_s27 }
  0x11   :  { %p794_p8 = por %p793_p7, %p792_p6 }
  0x13   :  { %p795_p9 = pnand %p794_p8, %p788_p5 }
  0x15   :  { %798 = shalt.err (!%p795_p9)
}
  0x16   :  { %24 = dma.hbm_to_vmem [thread:$0]  %s961_s0, 256, %s19_s21, [#allocation3], %s847_s23, %s847_s23, %s848_s24  }
  0x17   :  { %s849_s30 = smov [#allocation7]  }
  0x18   :  { %s44_s6 = sshll.u32 %s849_s30, 4  ;;  %s45_s6 = int_to_ptr.vmem [resolvable:$true] %s44_s6 }
  0x19   :  { %s807_s7 = scalar_lea.vmem %s45_s6, 6144  ;;  %p812_p11 = scmp.lt.s32.totalorder %s45_s6, %s45_s6 }
  0x1a   :  { %p808_p10 = scmp.ne.s32.totalorder %s45_s6, %s807_s7  ;;  %p813_p12 = scmp.lt.s32.totalorder %s807_s7, %s807_s7 }
  0x1c   :  { %p814_p13 = por %p813_p12, %p812_p11 }
  0x1e   :  { %p815_p0 = pnand %p814_p13, %p808_p10 }
  0x20   :  { %818 = shalt.err (!%p815_p0)
}
  0x21   :  { %50 = dma.hbm_to_vmem [thread:$0]  %s964_s3, 6144, %s45_s6, [#allocation6], %s847_s23, %s847_s23, %s848_s24  }
  0x22   :  { %839 = dma.done.wait [#allocation3], 256  }
  0x23   :  { %840 = vsyncadd [#allocation3], 4294967040 }
  0x24   :  { %841 = dma.done.wait [#allocation6], 12288  }
  0x25   :  { %842 = vsyncadd [#allocation6], 4294955008  ;;  %v148_v0 = vld [vmem:[#allocation5 + $0xf8] sm:$0xff]  ;;  %v147_v2 = vld [vmem:[#allocation5 + $0xf0] sm:$0xff]  ;;  %v64_v31 = vlaneseq  ;;  %s850_s10 = smov [#allocation8]  }
  0x26   :  { %v132_v1 = vld [vmem:[#allocation5 + $0x78] sm:$0xff]  ;;  %571 = vmatprep.subr.mxu0 %v148_v0  ;;  %v131_v3 = vld [vmem:[#allocation5 + $0x70] sm:$0xff]  ;;  %v146_v5 = vld [vmem:[#allocation5 + $0xe8] sm:$0xff]  ;;  %s552_s11 = sshll.u32 %s850_s10, 4  ;;  %s553_s11 = int_to_ptr.vmem [resolvable:$true] %s552_s11 }
  0x27   :  { %v164_v4 = vld [vmem:[#allocation5 + $0x178] sm:$0xff]  ;;  %572 = vmatpush3.msra.mxu0 %v132_v1  ;;  %v163_v6 = vld [vmem:[#allocation5 + $0x170] sm:$0xff]  ;;  %v130_v7 = vld [vmem:[#allocation5 + $0x68] sm:$0xff]  ;;  %v899_v39 = vshrl.u32 %v64_v31, 7  ;;  %p824_p2 = scmp.lt.s32.totalorder %s553_s11, %s553_s11 }
  0x28   :  { %683 = vmatprep.subr.mxu1 %v164_v4  ;;  %573 = vmatprep.subr.mxu0 %v147_v2  ;;  %v162_v8 = vld [vmem:[#allocation5 + $0x168] sm:$0xff]  ;;  %v145_v9 = vld [vmem:[#allocation5 + $0xe0] sm:$0xff]  ;;  %v144_v12 = vld [vmem:[#allocation5 + $0xd8] sm:$0xff] }
  0x29   :  { %684 = vmatpush3.msra.mxu1 %v164_v4  ;;  %574 = vmatpush3.msra.mxu0 %v131_v3  ;;  %v129_v10 = vld [vmem:[#allocation5 + $0x60] sm:$0xff]  ;;  %v128_v13 = vld [vmem:[#allocation5 + $0x58] sm:$0xff]  ;;  %v143_v15 = vld [vmem:[#allocation5 + $0xd0] sm:$0xff]  ;;  %v66_v46 = vadd.s32 8, %v899_v39  ;;  %v71_v49 = vand.u32 15, %v899_v39  ;;  %vm97_vm0 = vcmp.lt.s32.totalorder %v899_v39, 1 }
  0x2a   :  { %685 = vmatprep.subr.mxu1 %v163_v6  ;;  %575 = vmatprep.subr.mxu0 %v146_v5  ;;  %v161_v11 = vld [vmem:[#allocation5 + $0x160] sm:$0xff]  ;;  %v160_v14 = vld [vmem:[#allocation5 + $0x158] sm:$0xff]  ;;  %v127_v16 = vld [vmem:[#allocation5 + $0x50] sm:$0xff]  ;;  %vm108_vm1 = vcmp.lt.s32.totalorder %v899_v39, 7 }
  0x2b   :  { %686 = vmatpush3.msra.mxu1 %v163_v6  ;;  %576 = vmatpush3.msra.mxu0 %v130_v7  ;;  %v159_v17 = vld [vmem:[#allocation5 + $0x150] sm:$0xff]  ;;  %v142_v18 = vld [vmem:[#allocation5 + $0xc8] sm:$0xff]  ;;  %v141_v21 = vld [vmem:[#allocation5 + $0xc0] sm:$0xff]  ;;  %v78_v57 = vand.u32 15, %v66_v46  ;;  %vm914_vm2 = vcmp.ne.s32.totalorder %v71_v49, 0 }
  0x2c   :  { %687 = vmatprep.subr.mxu1 %v162_v8  ;;  %577 = vmatprep.subr.mxu0 %v145_v9  ;;  %v126_v19 = vld [vmem:[#allocation5 + $0x48] sm:$0xff]  ;;  %v125_v22 = vld [vmem:[#allocation5 + $0x40] sm:$0xff]  ;;  %v140_v24 = vld [vmem:[#allocation5 + $0xb8] sm:$0xff] }
  0x2d   :  { %688 = vmatpush3.msra.mxu1 %v162_v8  ;;  %578 = vmatpush3.msra.mxu0 %v129_v10  ;;  %v158_v20 = vld [vmem:[#allocation5 + $0x148] sm:$0xff]  ;;  %v157_v23 = vld [vmem:[#allocation5 + $0x140] sm:$0xff]  ;;  %v124_v25 = vld [vmem:[#allocation5 + $0x38] sm:$0xff]  ;;  %vm924_vm3 = vcmp.ne.s32.totalorder %v78_v57, 15 }
  0x2e   :  { %689 = vmatprep.subr.mxu1 %v161_v11  ;;  %579 = vmatprep.subr.mxu0 %v144_v12  ;;  %v156_v26 = vld [vmem:[#allocation5 + $0x138] sm:$0xff]  ;;  %v139_v27 = vld [vmem:[#allocation5 + $0xb0] sm:$0xff]  ;;  %v138_v30 = vld [vmem:[#allocation5 + $0xa8] sm:$0xff] }
  0x2f   :  { %690 = vmatpush3.msra.mxu1 %v161_v11  ;;  %580 = vmatpush3.msra.mxu0 %v128_v13  ;;  %v123_v28 = vld [vmem:[#allocation5 + $0x30] sm:$0xff]  ;;  %v122_v32 = vld [vmem:[#allocation5 + $0x28] sm:$0xff]  ;;  %v137_v34 = vld [vmem:[#allocation5 + $0xa0] sm:$0xff] }
  0x30   :  { %691 = vmatprep.subr.mxu1 %v160_v14  ;;  %581 = vmatprep.subr.mxu0 %v143_v15  ;;  %v155_v29 = vld [vmem:[#allocation5 + $0x130] sm:$0xff]  ;;  %v154_v33 = vld [vmem:[#allocation5 + $0x128] sm:$0xff]  ;;  %v121_v35 = vld [vmem:[#allocation5 + $0x20] sm:$0xff] }
  0x31   :  { %692 = vmatpush3.msra.mxu1 %v160_v14  ;;  %582 = vmatpush3.msra.mxu0 %v127_v16  ;;  %v153_v36 = vld [vmem:[#allocation5 + $0x120] sm:$0xff]  ;;  %v136_v37 = vld [vmem:[#allocation5 + $0x98] sm:$0xff]  ;;  %v901_v41 = vld [vmem:[#allocation2] sm:$0xff] }
  0x32   :  { %693 = vmatprep.subr.mxu1 %v159_v17  ;;  %583 = vmatprep.subr.mxu0 %v142_v18  ;;  %v120_v38 = vld [vmem:[#allocation5 + $0x18] sm:$0xff]  ;;  %v135_v43 = vld [vmem:[#allocation5 + $0x90] sm:$0xff]  ;;  %v134_v47 = vld [vmem:[#allocation5 + $0x88] sm:$0xff]  ;;  %v95_v48 = vrot.slane %v901_v41, 7  ;;  %v106_v54 = vrot.slane %v901_v41, 1 }
  0x33   :  { %694 = vmatpush3.msra.mxu1 %v159_v17  ;;  %584 = vmatpush3.msra.mxu0 %v126_v19  ;;  %v152_v40 = vld [vmem:[#allocation5 + $0x118] sm:$0xff]  ;;  %v119_v44 = vld [vmem:[#allocation5 + $0x10] sm:$0xff]  ;;  %v118_v51 = vld [vmem:[#allocation5 + $0x8] sm:$0xff] }
  0x34   :  { %695 = vmatprep.subr.mxu1 %v158_v20  ;;  %585 = vmatprep.subr.mxu0 %v141_v21  ;;  %v903_v42 = vld [vmem:[#allocation2 + $0x8] sm:$0xff]  ;;  %v151_v45 = vld [vmem:[#allocation5 + $0x110] sm:$0xff]  ;;  %v133_v52 = vld [vmem:[#allocation5 + $0x80] sm:$0xff] }
  0x35   :  { %696 = vmatpush3.msra.mxu1 %v158_v20  ;;  %586 = vmatpush3.msra.mxu0 %v125_v22  ;;  %v96_v50 = vrot.slane %v903_v42, 7  ;;  %v150_v53 = vld [vmem:[#allocation5 + $0x108] sm:$0xff]  ;;  %v107_v55 = vrot.slane %v903_v42, 1  ;;  %v117_v56 = vld [vmem:[#allocation5] sm:$0xff]  ;;  %v367_v62 = vld [vmem:[#allocation7 + $0xf8] sm:$0xff] }
  0x36   :  { %697 = vmatprep.subr.mxu1 %v157_v23  ;;  %587 = vmatprep.subr.mxu0 %v140_v24  ;;  %v149_v60 = vld [vmem:[#allocation5 + $0x100] sm:$0xff]  ;;  %v351_v1 = vld [vmem:[#allocation7 + $0x78] sm:$0xff]  ;;  %v366_v4 = vld [vmem:[#allocation7 + $0xf0] sm:$0xff] }
  0x37   :  { %698 = vmatpush3.msra.mxu1 %v157_v23  ;;  %588 = vmatpush3.msra.mxu0 %v124_v25  ;;  %v99_v59 = vsel %vm97_vm0, %v96_v50, %v95_v48  ;;  %v109_v61 = vsel %vm108_vm1, %v106_v54, %v107_v55  ;;  %v110_v0 = vsel %vm108_vm1, %v107_v55, %v106_v54  ;;  %v383_v3 = vld [vmem:[#allocation7 + $0x178] sm:$0xff]  ;;  %v350_v5 = vld [vmem:[#allocation7 + $0x70] sm:$0xff]  ;;  %v365_v7 = vld [vmem:[#allocation7 + $0xe8] sm:$0xff] }
  0x38   :  { %699 = vmatprep.subr.mxu1 %v156_v26  ;;  %589 = vmatprep.subr.mxu0 %v139_v27  ;;  %v98_v2 = vsel %vm97_vm0, %v95_v48, %v96_v50  ;;  %v382_v6 = vld [vmem:[#allocation7 + $0x170] sm:$0xff]  ;;  %v349_v8 = vld [vmem:[#allocation7 + $0x68] sm:$0xff]  ;;  %v364_v10 = vld [vmem:[#allocation7 + $0xe0] sm:$0xff] }
  0x39   :  { %700 = vmatpush3.msra.mxu1 %v156_v26  ;;  %590 = vmatpush3.msra.mxu0 %v123_v28  ;;  %v381_v9 = vld [vmem:[#allocation7 + $0x168] sm:$0xff]  ;;  %v348_v11 = vld [vmem:[#allocation7 + $0x60] sm:$0xff]  ;;  %v363_v13 = vld [vmem:[#allocation7 + $0xd8] sm:$0xff] }
  0x3a   :  { %701 = vmatprep.subr.mxu1 %v155_v29  ;;  %591 = vmatprep.subr.mxu0 %v138_v30  ;;  %v380_v12 = vld [vmem:[#allocation7 + $0x160] sm:$0xff]  ;;  %v347_v14 = vld [vmem:[#allocation7 + $0x58] sm:$0xff]  ;;  %v362_v16 = vld [vmem:[#allocation7 + $0xd0] sm:$0xff] }
  0x3b   :  { %702 = vmatpush3.msra.mxu1 %v155_v29  ;;  %592 = vmatpush3.msra.mxu0 %v122_v32  ;;  %v379_v15 = vld [vmem:[#allocation7 + $0x158] sm:$0xff]  ;;  %v346_v17 = vld [vmem:[#allocation7 + $0x50] sm:$0xff]  ;;  %v361_v19 = vld [vmem:[#allocation7 + $0xc8] sm:$0xff] }
  0x3c   :  { %703 = vmatprep.subr.mxu1 %v154_v33  ;;  %593 = vmatprep.subr.mxu0 %v137_v34  ;;  %v378_v18 = vld [vmem:[#allocation7 + $0x150] sm:$0xff]  ;;  %v345_v20 = vld [vmem:[#allocation7 + $0x48] sm:$0xff]  ;;  %v360_v22 = vld [vmem:[#allocation7 + $0xc0] sm:$0xff] }
  0x3d   :  { %704 = vmatpush3.msra.mxu1 %v154_v33  ;;  %594 = vmatpush3.msra.mxu0 %v121_v35  ;;  %v377_v21 = vld [vmem:[#allocation7 + $0x148] sm:$0xff]  ;;  %v344_v23 = vld [vmem:[#allocation7 + $0x40] sm:$0xff]  ;;  %v359_v25 = vld [vmem:[#allocation7 + $0xb8] sm:$0xff] }
  0x3e   :  { %705 = vmatprep.subr.mxu1 %v153_v36  ;;  %595 = vmatprep.subr.mxu0 %v136_v37  ;;  %v376_v24 = vld [vmem:[#allocation7 + $0x140] sm:$0xff]  ;;  %v343_v26 = vld [vmem:[#allocation7 + $0x38] sm:$0xff]  ;;  %v358_v28 = vld [vmem:[#allocation7 + $0xb0] sm:$0xff] }
  0x3f   :  { %706 = vmatpush3.msra.mxu1 %v153_v36  ;;  %596 = vmatpush3.msra.mxu0 %v120_v38  ;;  %v375_v27 = vld [vmem:[#allocation7 + $0x138] sm:$0xff]  ;;  %v342_v29 = vld [vmem:[#allocation7 + $0x30] sm:$0xff]  ;;  %v357_v31 = vld [vmem:[#allocation7 + $0xa8] sm:$0xff] }
  0x40   :  { %707 = vmatprep.subr.mxu1 %v152_v40  ;;  %597 = vmatprep.subr.mxu0 %v135_v43  ;;  %v374_v30 = vld [vmem:[#allocation7 + $0x130] sm:$0xff]  ;;  %v341_v32 = vld [vmem:[#allocation7 + $0x28] sm:$0xff]  ;;  %v356_v34 = vld [vmem:[#allocation7 + $0xa0] sm:$0xff] }
  0x41   :  { %708 = vmatpush3.msra.mxu1 %v152_v40  ;;  %598 = vmatpush3.msra.mxu0 %v119_v44  ;;  %v373_v33 = vld [vmem:[#allocation7 + $0x128] sm:$0xff]  ;;  %v340_v35 = vld [vmem:[#allocation7 + $0x20] sm:$0xff]  ;;  %v355_v37 = vld [vmem:[#allocation7 + $0x98] sm:$0xff] }
  0x42   :  { %709 = vmatprep.subr.mxu1 %v151_v45  ;;  %599 = vmatprep.subr.mxu0 %v134_v47  ;;  %v372_v36 = vld [vmem:[#allocation7 + $0x120] sm:$0xff]  ;;  %v339_v38 = vld [vmem:[#allocation7 + $0x18] sm:$0xff]  ;;  %v354_v43 = vld [vmem:[#allocation7 + $0x90] sm:$0xff] }
  0x43   :  { %236 = vmatprep.mubr.f32.mxu0 %v901_v41  ;;  %600 = vmatpush3.msra.mxu0 %v118_v51  ;;  %v371_v40 = vld [vmem:[#allocation7 + $0x118] sm:$0xff]  ;;  %v338_v44 = vld [vmem:[#allocation7 + $0x10] sm:$0xff]  ;;  %v353_v46 = vld [vmem:[#allocation7 + $0x88] sm:$0xff] }
  0x44   :  { %710 = vmatpush3.msra.mxu1 %v151_v45  ;;  %601 = vmatprep.subr.mxu0 %v133_v52  ;;  %v370_v45 = vld [vmem:[#allocation7 + $0x110] sm:$0xff]  ;;  %v337_v47 = vld [vmem:[#allocation7 + $0x8] sm:$0xff]  ;;  %v352_v49 = vld [vmem:[#allocation7 + $0x80] sm:$0xff] }
  0x45   :  { %711 = vmatprep.subr.mxu1 %v150_v53  ;;  %602 = vmatpush3.msra.mxu0 %v117_v56  ;;  %v369_v48 = vld [vmem:[#allocation7 + $0x108] sm:$0xff]  ;;  %v336_v50 = vld [vmem:[#allocation7] sm:$0xff]  ;;  %v565_v54 = vld [vmem:[%s963_s2] ss:$0 sm:$0xff] }
  0x46   :  { %712 = vmatpush3.msra.mxu1 %v150_v53  ;;  %566 = vmatmul.mubr.msk.f32.vlgmr.msra.gmra.mxu0 %vm914_vm2, %v99_v59  ;;  %v368_v51 = vld [vmem:[#allocation7 + $0x100] sm:$0xff] }
  0x47   :  { %713 = vmatprep.subr.mxu1 %v149_v60  ;;  %241 = vmatprep.mubr.f32.mxu0 %v903_v42 }
  0x48   :  { %714 = vmatpush3.msra.mxu1 %v149_v60  ;;  %715 = vmatprep.mubr.f32.mxu1 %v109_v61 }
  0x49   :  { %627 = vmatprep.subr.mxu0 %v367_v62  ;;  %716 = vmatmul.mubr.msk.f32.vlgmr.msra.gmra.mxu1 %vm924_vm3, %v110_v0 }
  0x4a   :  { %628 = vmatpush3.msra.mxu0 %v351_v1  ;;  %718 = vmatprep.subr.mxu1 %v383_v3 }
  0x4b   :  { %242 = vmatmul.mubr.f32.gmra.mxu0 %v98_v2  ;;  %629 = vmatprep.subr.mxu0 %v366_v4 }
  0x4c   :  { %719 = vmatpush3.msra.mxu1 %v383_v3  ;;  %630 = vmatpush3.msra.mxu0 %v350_v5 }
  0x4d   :  { %720 = vmatprep.subr.mxu1 %v382_v6  ;;  %631 = vmatprep.subr.mxu0 %v365_v7 }
  0x4e   :  { %721 = vmatpush3.msra.mxu1 %v382_v6  ;;  %632 = vmatpush3.msra.mxu0 %v349_v8 }
  0x4f   :  { %722 = vmatprep.subr.mxu1 %v381_v9  ;;  %633 = vmatprep.subr.mxu0 %v364_v10 }
  0x50   :  { %723 = vmatpush3.msra.mxu1 %v381_v9  ;;  %634 = vmatpush3.msra.mxu0 %v348_v11 }
  0x51   :  { %724 = vmatprep.subr.mxu1 %v380_v12  ;;  %635 = vmatprep.subr.mxu0 %v363_v13 }
  0x52   :  { %725 = vmatpush3.msra.mxu1 %v380_v12  ;;  %636 = vmatpush3.msra.mxu0 %v347_v14 }
  0x53   :  { %726 = vmatprep.subr.mxu1 %v379_v15  ;;  %637 = vmatprep.subr.mxu0 %v362_v16  ;;  %v568_v16 = vld [vmem:[%s965_s4] ss:$0 sm:$0xff]  ;;  %s819_s4 = scalar_lea.vmem %s553_s11, 256 }
  0x54   :  { %727 = vmatpush3.msra.mxu1 %v379_v15  ;;  %638 = vmatpush3.msra.mxu0 %v346_v17  ;;  %p820_p1 = scmp.ne.s32.totalorder %s553_s11, %s819_s4  ;;  %p825_p3 = scmp.lt.s32.totalorder %s819_s4, %s819_s4 }
  0x55   :  { %728 = vmatprep.subr.mxu1 %v378_v18  ;;  %639 = vmatprep.subr.mxu0 %v361_v19 }
  0x56   :  { %729 = vmatpush3.msra.mxu1 %v378_v18  ;;  %640 = vmatpush3.msra.mxu0 %v345_v20  ;;  %p826_p4 = por %p825_p3, %p824_p2 }
  0x57   :  { %730 = vmatprep.subr.mxu1 %v377_v21  ;;  %641 = vmatprep.subr.mxu0 %v360_v22 }
  0x58   :  { %731 = vmatpush3.msra.mxu1 %v377_v21  ;;  %642 = vmatpush3.msra.mxu0 %v344_v23  ;;  %p827_p5 = pnand %p826_p4, %p820_p1 }
  0x59   :  { %732 = vmatprep.subr.mxu1 %v376_v24  ;;  %643 = vmatprep.subr.mxu0 %v359_v25 }
  0x5a   :  { %733 = vmatpush3.msra.mxu1 %v376_v24  ;;  %644 = vmatpush3.msra.mxu0 %v343_v26 }
  0x5b   :  { %734 = vmatprep.subr.mxu1 %v375_v27  ;;  %645 = vmatprep.subr.mxu0 %v358_v28 }
  0x5c   :  { %735 = vmatpush3.msra.mxu1 %v375_v27  ;;  %646 = vmatpush3.msra.mxu0 %v342_v29 }
  0x5d   :  { %736 = vmatprep.subr.mxu1 %v374_v30  ;;  %647 = vmatprep.subr.mxu0 %v357_v31 }
  0x5e   :  { %737 = vmatpush3.msra.mxu1 %v374_v30  ;;  %648 = vmatpush3.msra.mxu0 %v341_v32 }
  0x5f   :  { %738 = vmatprep.subr.mxu1 %v373_v33  ;;  %649 = vmatprep.subr.mxu0 %v356_v34 }
  0x60   :  { %739 = vmatpush3.msra.mxu1 %v373_v33  ;;  %650 = vmatpush3.msra.mxu0 %v340_v35 }
  0x61   :  { %740 = vmatprep.subr.mxu1 %v372_v36  ;;  %651 = vmatprep.subr.mxu0 %v355_v37 }
  0x62   :  { %741 = vmatpush3.msra.mxu1 %v372_v36  ;;  %652 = vmatpush3.msra.mxu0 %v339_v38 }
  0x63   :  { %742 = vmatprep.subr.mxu1 %v371_v40  ;;  %653 = vmatprep.subr.mxu0 %v354_v43 }
  0x64   :  { %743 = vmatpush3.msra.mxu1 %v371_v40  ;;  %654 = vmatpush3.msra.mxu0 %v338_v44 }
  0x65   :  { %744 = vmatprep.subr.mxu1 %v370_v45  ;;  %655 = vmatprep.subr.mxu0 %v353_v46 }
  0x66   :  { %745 = vmatpush3.msra.mxu1 %v370_v45  ;;  %656 = vmatpush3.msra.mxu0 %v337_v47 }
  0x67   :  { %746 = vmatprep.subr.mxu1 %v369_v48  ;;  %657 = vmatprep.subr.mxu0 %v352_v49 }
  0x68   :  { %747 = vmatpush3.msra.mxu1 %v369_v48  ;;  %658 = vmatpush3.msra.mxu0 %v336_v50 }
  0x69   :  { %748 = vmatprep.subr.mxu1 %v368_v51 }
  0x6a   :  { %749 = vmatpush3.msra.mxu1 %v368_v51 }
 0x106   :  { %v603_v52 = vpop.f32.mrf.mxu0 }
 0x108   :  { %v604_v53 = vpop.f32.mrf.mxu0 }
 0x109   :  { %v605_v55 = vadd.f32 %v604_v53, %v603_v52  ;;  %v717_v56 = vpop.f32.mrf.mxu1 }
 0x10b   :  { %v606_v57 = vpop.f32.mrf.mxu0  ;;  %v239_v59 = vadd.f32 %v605_v55, %v565_v54  ;;  %v313_v60 = vpop.f32.mrf.mxu1 }
 0x10d   :  { %v607_v61 = vpop.f32.mrf.mxu0  ;;  %v314_v0 = vadd.f32 %v313_v60, %v239_v59 }
 0x10e   :  { %v608_v62 = vadd.f32 %v607_v61, %v606_v57 }
 0x10f   :  { %v322_v2 = vmax.f32 %v314_v0, 0.0 }
 0x110   :  { %v244_v1 = vadd.f32 %v608_v62, %v565_v54 }
 0x111   :  { %455 = vmatprep.mubr.f32.mxu0 %v322_v2  ;;  %v324_v6 = vrot.slane %v322_v2, 7  ;;  %v330_v7 = vrot.slane %v322_v2, 1 }
 0x112   :  { %v319_v3 = vadd.f32 %v717_v56, %v244_v1 }
 0x114   :  { %v323_v4 = vmax.f32 %v319_v3, 0.0 }
 0x116   :  { %v325_v5 = vrot.slane %v323_v4, 7  ;;  %v331_v8 = vrot.slane %v323_v4, 1 }
 0x118   :  { %v327_v9 = vsel %vm97_vm0, %v325_v5, %v324_v6  ;;  %v332_v10 = vsel %vm108_vm1, %v330_v7, %v331_v8  ;;  %v333_v11 = vsel %vm108_vm1, %v331_v8, %v330_v7  ;;  %v326_v12 = vsel %vm97_vm0, %v324_v6, %v325_v5 }
 0x119   :  { %569 = vmatmul.mubr.msk.f32.vlgmr.msra.gmra.mxu0 %vm914_vm2, %v327_v9  ;;  %750 = vmatprep.mubr.f32.mxu1 %v332_v10 }
 0x11a   :  { %460 = vmatprep.mubr.f32.mxu0 %v323_v4  ;;  %751 = vmatmul.mubr.msk.f32.vlgmr.msra.gmra.mxu1 %vm924_vm3, %v333_v11 }
 0x11d   :  { %461 = vmatmul.mubr.f32.gmra.mxu0 %v326_v12 }
 0x1d9   :  { %v659_v13 = vpop.f32.mrf.mxu0 }
 0x1da   :  { %v752_v14 = vpop.f32.mrf.mxu1 }
 0x1db   :  { %v660_v15 = vpop.f32.mrf.mxu0 }
 0x1dc   :  { %v661_v17 = vadd.f32 %v660_v15, %v659_v13  ;;  %v532_v19 = vpop.f32.mrf.mxu1 }
 0x1dd   :  { %v662_v18 = vpop.f32.mrf.mxu0 }
 0x1de   :  { %v458_v58 = vadd.f32 %v661_v17, %v568_v16 }
 0x1df   :  { %v663_v20 = vpop.f32.mrf.mxu0 }
 0x1e0   :  { %v533_v21 = vadd.f32 %v532_v19, %v458_v58  ;;  %v664_v22 = vadd.f32 %v663_v20, %v662_v18 }
 0x1e2   :  { %v541_v63 = vadd.f32 %v533_v21, %v901_v41  ;;  %v463_v23 = vadd.f32 %v664_v22, %v568_v16 }
 0x1e4   :  { %v543_v39 = vmax.f32 %v541_v63, 0.0  ;;  %v538_v24 = vadd.f32 %v752_v14, %v463_v23 }
 0x1e6   :  { %545 = vst [vmem:[#allocation8] sm:$0xff] %v543_v39  ;;  %v542_v25 = vadd.f32 %v538_v24, %v903_v42 }
 0x1e8   :  { %v544_v26 = vmax.f32 %v542_v25, 0.0 }
 0x1ea   :  { %546 = vst [vmem:[#allocation8 + $0x8] sm:$0xff] %v544_v26 }
 0x1eb   :  { %830 = shalt.err (!%p827_p5)
}
 0x1ec   :  { %558 = dma.vmem_to_hbm [thread:$0]  %s553_s11, 256, %s966_s5, [#allocation4], %s847_s23, %s847_s23, %s848_s24  }
 0x1ed   :  { %843 = dma.done.wait [#allocation4], 256  }
 0x1ee   :  { %844 = vsyncadd [#allocation4], 4294967040 }
 0x1ef   :  { %562 = vsyncpa [#allocation3], 1 }
 0x1f0   :  { %563 = vsyncpa [#allocation6], 1 }
 0x1f1   :  { %564 = vsyncpa [#allocation4], 1 }

</bundles_post_ra>
